<compile_context>
chip_gen: v7x
topology: tpu7x:2x2x1
jax: 0.10.0
libtpu: 0.0.40
codegen_flags: <defaults>
</compile_context>

<pallas_src>
import jax
import jax.numpy as jnp
from jax.experimental import pallas as pl
from jax.experimental.pallas import tpu as pltpu

IN_DIM = 784
HID_DIM = 64
OUT_DIM = 10

HID_PAD = 128   # hidden width padded to a full vreg lane width
OUT_PAD = 128   # fc4 output width padded to 128 lanes for the MXU (store is 10 wide)


def mlp_kernel(x_ref, w1_ref, b1_ref, w2_ref, b2_ref, o_ref):
    # x_ref : (tb, 784)   f32  (cast to bf16 in-kernel; no extra HBM cast pass)
    # w1_ref: (784, 128)  bf16 (cols 64..127 zero)
    # b1_ref: (1, 128)    f32  (cols 64..127 zero)
    # w2_ref: (128, 128)  bf16 (rows 64..127 and cols 10..127 zero)
    # b2_ref: (1, 128)    f32  (cols 10..127 zero)
    # o_ref : (tb, 10)    f32
    x = x_ref[...].astype(jnp.bfloat16)

    # fc1 + ReLU (MXU bf16 matmul, f32 accumulation). Padded hidden lanes stay 0.
    h = jnp.dot(x, w1_ref[...], preferred_element_type=jnp.float32) + b1_ref[...]
    h = jnp.maximum(h, 0.0).astype(jnp.bfloat16)

    # dropout(p=0.2) -> identity at inference

    # fc4 on the 128-lane padded weights; only the first 10 columns are meaningful.
    logits = jnp.dot(h, w2_ref[...], preferred_element_type=jnp.float32) + b2_ref[...]
    logits = logits[:, :OUT_DIM]

    # log_softmax over dim=1 (numerically stable), computed on the 10 valid lanes only.
    m = jnp.max(logits, axis=1, keepdims=True)
    z = logits - m
    lse = jnp.log(jnp.sum(jnp.exp(z), axis=1, keepdims=True))
    o_ref[...] = (z - lse).astype(o_ref.dtype)


def prepare_params(w1_t, b1, w2_t, b2):
    """Pad/cast parameters once (hoisted out of the per-call forward path).

    w1_t : (784, 64)  fc1 weight, stored transposed (in, out)
    b1   : (64,)      fc1 bias
    w2_t : (64, 10)   fc4 weight, stored transposed (in, out)
    b2   : (10,)      fc4 bias
    """
    w1p = jnp.zeros((IN_DIM, HID_PAD), jnp.bfloat16).at[:, :HID_DIM].set(
        w1_t.astype(jnp.bfloat16))
    b1p = jnp.zeros((1, HID_PAD), jnp.float32).at[:, :HID_DIM].set(
        b1.reshape(1, HID_DIM).astype(jnp.float32))
    w2p = jnp.zeros((HID_PAD, OUT_PAD), jnp.bfloat16).at[:HID_DIM, :OUT_DIM].set(
        w2_t.astype(jnp.bfloat16))
    b2p = jnp.zeros((1, OUT_PAD), jnp.float32).at[:, :OUT_DIM].set(
        b2.reshape(1, OUT_DIM).astype(jnp.float32))
    return w1p, b1p, w2p, b2p


def network_forward(x, params, *, tb=2048):
    """Forward pass of `Network`.

    x      : (B, 784) or (B, 1, 28, 28) float32 (flattened like torch's x.view(B, -1))
    params : output of prepare_params()
    Returns log-probabilities (B, 10) float32.
    """
    w1p, b1p, w2p, b2p = params

    B = x.shape[0]
    x2 = x.reshape(B, -1)
    assert x2.shape[1] == IN_DIM, f"expected {IN_DIM} input features, got {x2.shape[1]}"
    x2 = x2.astype(jnp.float32)

    # --- batch tile selection --------------------------------------------------------
    # Keep at least 2 grid steps when B >= 16 so the "parallel" batch axis can shard
    # across v7x's two TensorCores; the ragged tail block (if any) is masked by Pallas.
    tb = max(8, (tb // 8) * 8)
    if B >= 16:
        half = ((pl.cdiv(B, 2) + 7) // 8) * 8
        tb_eff = max(8, min(tb, half))
    else:
        tb_eff = B  # single block; block dim equals the full array dim (always legal)

    grid = (pl.cdiv(B, tb_eff),)

    out = pl.pallas_call(
        mlp_kernel,
        out_shape=jax.ShapeDtypeStruct((B, OUT_DIM), jnp.float32),
        grid_spec=pltpu.PrefetchScalarGridSpec(
            num_scalar_prefetch=0,
            grid=grid,
            in_specs=[
                pl.BlockSpec((tb_eff, IN_DIM), lambda i: (i, 0)),    # x tile over batch
                pl.BlockSpec((IN_DIM, HID_PAD), lambda i: (0, 0)),   # fc1 weight (resident)
                pl.BlockSpec((1, HID_PAD), lambda i: (0, 0)),        # fc1 bias
                pl.BlockSpec((HID_PAD, OUT_PAD), lambda i: (0, 0)),  # fc4 weight (resident)
                pl.BlockSpec((1, OUT_PAD), lambda i: (0, 0)),        # fc4 bias
            ],
            out_specs=pl.BlockSpec((tb_eff, OUT_DIM), lambda i: (i, 0)),  # narrow 10-wide store
        ),
        compiler_params=pltpu.CompilerParams(
            # Batch axis shards across TensorCores (v7x megacore) when grid >= 2.
            dimension_semantics=("parallel",),
            # f32 x tiles at tb=2048 (~6.4 MiB, double-buffered) + resident weights +
            # narrow output stay well under 48 MiB on v5e/v6e/v7x; raise tb if B is huge.
            vmem_limit_bytes=48 * 1024 * 1024,
        ),
    )(x2, w1p, b1p, w2p, b2p)

    return out


def init_params(key):
    """Deterministic init mimicking torch.nn.Linear defaults:
    U(-1/sqrt(fan_in), 1/sqrt(fan_in)) for both weight and bias."""
    k1, k2, k3, k4 = jax.random.split(key, 4)
    bound1 = 1.0 / jnp.sqrt(jnp.float32(IN_DIM))
    bound2 = 1.0 / jnp.sqrt(jnp.float32(HID_DIM))
    # Stored transposed: (in, out)
    w1_t = jax.random.uniform(k1, (IN_DIM, HID_DIM), jnp.float32, -bound1, bound1)
    b1 = jax.random.uniform(k2, (HID_DIM,), jnp.float32, -bound1, bound1)
    w2_t = jax.random.uniform(k3, (HID_DIM, OUT_DIM), jnp.float32, -bound2, bound2)
    b2 = jax.random.uniform(k4, (OUT_DIM,), jnp.float32, -bound2, bound2)
    return w1_t, b1, w2_t, b2


def reference_forward(x, w1_t, b1, w2_t, b2):
    """Plain-JAX f32 reference (eval-mode dropout == identity)."""
    x2 = x.reshape(x.shape[0], -1)
    h = jnp.maximum(x2 @ w1_t + b1[None, :], 0.0)
    logits = h @ w2_t + b2[None, :]
    return jax.nn.log_softmax(logits, axis=1)


if __name__ == "__main__":
    key = jax.random.PRNGKey(0)
    kx, kp = jax.random.split(key)

    # Small MNIST-like batch: (B, 1, 28, 28) pixels in [0, 1)
    B = 32
    x = jax.random.uniform(kx, (B, 1, 28, 28), jnp.float32)

    w1_t, b1, w2_t, b2 = init_params(kp)
    params = prepare_params(w1_t, b1, w2_t, b2)   # hoisted one-time padding/casts

    out = network_forward(x, params)
    out = jax.block_until_ready(out)

    # sanity check against plain-JAX f32 reference (bf16 matmuls -> looser tolerance)
    ref = reference_forward(x, w1_t, b1, w2_t, b2)
    assert out.shape == (B, OUT_DIM)
    assert bool(jnp.all(jnp.isfinite(out))), "non-finite values in output"
    assert jnp.allclose(out, ref, atol=3e-2, rtol=3e-2), "mismatch vs reference"

    print("KERNEL_OK")
</pallas_src>

<mosaic_0001>
module attributes {stable_mosaic.version = 11 : i64} {
  func.func @mlp_kernel(%arg0: i32, %arg1: memref<16x784xf32, #tpu.memory_space<vmem>>, %arg2: memref<784x128xbf16, #tpu.memory_space<vmem>>, %arg3: memref<1x128xf32, #tpu.memory_space<vmem>>, %arg4: memref<128x128xbf16, #tpu.memory_space<vmem>>, %arg5: memref<1x128xf32, #tpu.memory_space<vmem>>, %arg6: memref<16x10xf32, #tpu.memory_space<vmem>>) attributes {dimension_semantics = [#tpu.dimension_semantics<parallel>], iteration_bounds = array<i64: 2>, scalar_prefetch = 0 : i64, scratch_operands = 0 : i64, tpu.core_type = #tpu.core_type<tc>, window_params = [{transform_indices = @transform_0, window_bounds = array<i64: 16, 784>}, {pipeline_mode = #tpu.pipeline_mode<synchronous>, transform_indices = @transform_1, window_bounds = array<i64: 784, 128>}, {pipeline_mode = #tpu.pipeline_mode<synchronous>, transform_indices = @transform_2, window_bounds = array<i64: 1, 128>}, {pipeline_mode = #tpu.pipeline_mode<synchronous>, transform_indices = @transform_3, window_bounds = array<i64: 128, 128>}, {pipeline_mode = #tpu.pipeline_mode<synchronous>, transform_indices = @transform_4, window_bounds = array<i64: 1, 128>}, {transform_indices = @transform_5, window_bounds = array<i64: 16, 10>}]} {
    %c0 = arith.constant 0 : index
    %c0_0 = arith.constant 0 : index
    %0 = vector.load %arg1[%c0, %c0_0] : memref<16x784xf32, #tpu.memory_space<vmem>>, vector<16x784xf32>
    %1 = arith.truncf %0 : vector<16x784xf32> to vector<16x784xbf16>
    %c0_1 = arith.constant 0 : index
    %c0_2 = arith.constant 0 : index
    %2 = vector.load %arg2[%c0_1, %c0_2] : memref<784x128xbf16, #tpu.memory_space<vmem>>, vector<784x128xbf16>
    %cst = arith.constant dense<0.000000e+00> : vector<16x128xf32>
    %3 = tpu.matmul %1, %2, %cst {dimension_numbers = #tpu.dot_dimension_numbers<[1], [0], [0], [1], [0, 0, 1, 1], [], []>} : vector<16x784xbf16>, vector<784x128xbf16>, vector<16x128xf32> -> vector<16x128xf32>
    %c0_3 = arith.constant 0 : index
    %c0_4 = arith.constant 0 : index
    %4 = vector.load %arg3[%c0_3, %c0_4] : memref<1x128xf32, #tpu.memory_space<vmem>>, vector<1x128xf32>
    %5 = vector.broadcast %4 : vector<1x128xf32> to vector<16x128xf32>
    %6 = arith.addf %3, %5 : vector<16x128xf32>
    %cst_5 = arith.constant 0.000000e+00 : f32
    %7 = vector.broadcast %cst_5 : f32 to vector<16x128xf32>
    %8 = arith.maximumf %6, %7 : vector<16x128xf32>
    %9 = arith.truncf %8 : vector<16x128xf32> to vector<16x128xbf16>
    %c0_6 = arith.constant 0 : index
    %c0_7 = arith.constant 0 : index
    %10 = vector.load %arg4[%c0_6, %c0_7] : memref<128x128xbf16, #tpu.memory_space<vmem>>, vector<128x128xbf16>
    %cst_8 = arith.constant dense<0.000000e+00> : vector<16x128xf32>
    %11 = tpu.matmul %9, %10, %cst_8 {dimension_numbers = #tpu.dot_dimension_numbers<[1], [0], [0], [1], [0, 0, 1, 1], [], []>} : vector<16x128xbf16>, vector<128x128xbf16>, vector<16x128xf32> -> vector<16x128xf32>
    %c0_9 = arith.constant 0 : index
    %c0_10 = arith.constant 0 : index
    %12 = vector.load %arg5[%c0_9, %c0_10] : memref<1x128xf32, #tpu.memory_space<vmem>>, vector<1x128xf32>
    %13 = vector.broadcast %12 : vector<1x128xf32> to vector<16x128xf32>
    %14 = arith.addf %11, %13 : vector<16x128xf32>
    %15 = vector.extract_strided_slice %14 {offsets = [0, 0], sizes = [16, 10], strides = [1, 1]} : vector<16x128xf32> to vector<16x10xf32>
    %cst_11 = arith.constant dense<0xFF800000> : vector<16xf32>
    %16 = vector.multi_reduction <maximumf>, %15, %cst_11 [1] : vector<16x10xf32> to vector<16xf32>
    %17 = vector.shape_cast %16 : vector<16xf32> to vector<16x1xf32>
    %18 = vector.broadcast %17 : vector<16x1xf32> to vector<16x10xf32>
    %19 = arith.subf %15, %18 : vector<16x10xf32>
    %20 = math.exp %19 : vector<16x10xf32>
    %cst_12 = arith.constant dense<0.000000e+00> : vector<16xf32>
    %21 = vector.multi_reduction <add>, %20, %cst_12 [1] : vector<16x10xf32> to vector<16xf32>
    %22 = vector.shape_cast %21 : vector<16xf32> to vector<16x1xf32>
    %23 = math.log %22 : vector<16x1xf32>
    %24 = vector.broadcast %23 : vector<16x1xf32> to vector<16x10xf32>
    %25 = arith.subf %19, %24 : vector<16x10xf32>
    %c0_13 = arith.constant 0 : index
    %c0_14 = arith.constant 0 : index
    %26 = vector.load %arg6[%c0_13, %c0_14] : memref<16x10xf32, #tpu.memory_space<vmem>>, vector<16x10xf32>
    tpu.vector_store %arg6[%c0_13, %c0_14], %25 {strides = array<i32>} : memref<16x10xf32, #tpu.memory_space<vmem>>, vector<16x10xf32>,
    return
  }
  func.func @transform_0(%arg0: i32) -> (i32, i32) {
    %c0_i32 = arith.constant 0 : i32
    %c0_i32_0 = arith.constant 0 : i32
    return %arg0, %c0_i32 : i32, i32
  }
  func.func @transform_1(%arg0: i32) -> (i32, i32) {
    %c0_i32 = arith.constant 0 : i32
    %c0_i32_0 = arith.constant 0 : i32
    %c0_i32_1 = arith.constant 0 : i32
    return %c0_i32, %c0_i32_0 : i32, i32
  }
  func.func @transform_2(%arg0: i32) -> (i32, i32) {
    %c0_i32 = arith.constant 0 : i32
    %c0_i32_0 = arith.constant 0 : i32
    %c0_i32_1 = arith.constant 0 : i32
    return %c0_i32, %c0_i32_0 : i32, i32
  }
  func.func @transform_3(%arg0: i32) -> (i32, i32) {
    %c0_i32 = arith.constant 0 : i32
    %c0_i32_0 = arith.constant 0 : i32
    %c0_i32_1 = arith.constant 0 : i32
    return %c0_i32, %c0_i32_0 : i32, i32
  }
  func.func @transform_4(%arg0: i32) -> (i32, i32) {
    %c0_i32 = arith.constant 0 : i32
    %c0_i32_0 = arith.constant 0 : i32
    %c0_i32_1 = arith.constant 0 : i32
    return %c0_i32, %c0_i32_0 : i32, i32
  }
  func.func @transform_5(%arg0: i32) -> (i32, i32) {
    %c0_i32 = arith.constant 0 : i32
    %c0_i32_0 = arith.constant 0 : i32
    return %arg0, %c0_i32 : i32, i32
  }
}

</mosaic_0001>

<bundles_post_ra>
// kernel: tpu_custom_call.1
= control target key start
LH: loop header
LB: loop body
LE: loop exit
PB: predicated region body
PF: predicated region fallthrough
CT: control target
= control target key end

     0   :  { %10 = vsyncpa [#allocation3], 0  ;;  %s1791_s0 = inlined_call_operand.hbm [shape: f32[32,784], index: 0, kind: input, shape index: {}]   ;;  %s1792_s1 = inlined_call_operand.hbm [shape: bf16[784,128], index: 1, kind: input, shape index: {}]   ;;  %s1793_s2 = inlined_call_operand.vmem [shape: f32[1,128], index: 2, kind: input, shape index: {}]   ;;  %s1794_s3 = inlined_call_operand.hbm [shape: bf16[128,128], index: 3, kind: input, shape index: {}]   ;;  %s1795_s4 = inlined_call_operand.vmem [shape: f32[1,128], index: 4, kind: input, shape index: {}]   ;;  %s1796_s5 = inlined_call_operand.vmem [shape: f32[32,10], index: 5, kind: output, shape index: {}]  }
   0x1   :  { %12 = vsyncpa [#allocation3 + $0x1], 0 }
   0x2   :  { %13 = vsyncpa [#allocation5], 0  ;;  %s1572_s18 = smov 0   ;;  %s1574_s19 = smov 0  }
   0x3   :  { %s1576_s20 = smov 0   ;;  %s1578_s21 = smov 0  }
   0x4 LB: > { %s1094_s22 = sadd.s32 4294967295, %s1531_s21   ;;  %p39_p0 = scmp.ne.s32.totalorder %s1523_s19, %s1519_s18  ;;  %s1531_s21 = sphi %s1578_s21, %s1812_s21   ;;  %s1527_s20 = sphi %s1576_s20, %s1811_s20   ;;  %s1523_s19 = sphi %s1574_s19, %s1810_s19   ;;  %s1519_s18 = sphi %s1572_s18, %s1809_s18  }
   0x5   : > { %p1594_p1 = scmp.eq.s32.totalorder %s1094_s22, 0  ;;  %p1096_p2 = scmp.ge.s32.totalorder %s1531_s21, 1 }
   0x6   : > { %p160_p3 = scmp.lt.s32.totalorder %s1531_s21, 3  ;;  %s1533_s26 = smov [#allocation4]  }
   0x7   : > { %s1801_s23 = scalar_select %p1594_p1, 1, 0 }
   0x8   : > { %p1602_p4 = por %p1594_p1, %p39_p0  ;;  %p1606_p5 = pnand %p1096_p2, %p160_p3 }
   0x9   : > { %s172_s27 = sshll.u32 %s1533_s26, 4  ;;  %s1534_s29 = smov [#allocation6]   ;;  %s173_s27 = int_to_ptr.vmem [resolvable:$true] %s172_s27 }
   0xa   : > { %s1802_s24 = scalar_select %p1602_p4, 1, 0 }
   0xb   : > { %s1803_s25 = scalar_select %p1606_p5, 1, 0 }
   0xc   : > { %p1286_p6 = pneg %p1606_p5  ;;  %s188_s30 = sshll.u32 %s1534_s29, 4  ;;  %s1618_s30 = int_to_ptr.vmem [resolvable:$true] %s188_s30 }
   0xd   : > { %s1407_s8 = scalar_lea.hbm %s1792_s1, 6272 }
   0xe   : > { %p1614_p7 = pnand %p1286_p6, %p1594_p1  ;;  %p1408_p8 = scmp.ne.s32.totalorder %s1792_s1, %s1407_s8 }
   0xf   : > { %p1414_p12 = scmp.lt.u32.totalorder %s1407_s8, %s1792_s1 }
  0x10   : > { %p1409_p9 = pneg %p1614_p7 }
  0x12   : > { %p1410_p10 = pnand %p1409_p9, %p1408_p8 }
  0x14   : > { %p1411_p11 = pneg %p1410_p10 }
  0x16   : > { %p1416_p13 = pnand %p1414_p12, %p1411_p11 }
  0x18   : > { %1419 = shalt.err (!%p1416_p13)
}
  0x19   : > { %s1420_s13 = scalar_lea.vmem %s173_s27, 6272  ;;  %p1428_p6 = scmp.lt.s32.totalorder %s173_s27, %s173_s27 }
  0x1a   : > { %p1421_p0 = scmp.ne.s32.totalorder %s173_s27, %s1420_s13  ;;  %p1429_p1 = scmp.lt.s32.totalorder %s1420_s13, %s1420_s13 }
  0x1c   : > { %p1423_p2 = pnand %p1421_p0, %p1409_p9  ;;  %p1430_p4 = por %p1429_p1, %p1428_p6 }
  0x1e   : > { %p1424_p3 = pneg %p1423_p2 }
  0x20   : > { %p1431_p5 = pnand %p1430_p4, %p1424_p3 }
  0x22   : > { %1434 = shalt.err (!%p1431_p5)
}
  0x23   : > { %s1535_s14 = smov 64   ;;  %s1536_s15 = smov 4  }
  0x24   : > { %1289 = dma.hbm_to_vmem [thread:$0]  (!%p1614_p7), %s1792_s1, 6272, %s173_s27, [#allocation5], %s1535_s14, %s1535_s14, %s1536_s15  }
  0x25   : > { %s1435_s29 = scalar_lea.hbm %s1794_s3, 1024 }
  0x26   : > { %p1436_p8 = scmp.ne.s32.totalorder %s1794_s3, %s1435_s29  ;;  %p1442_p5 = scmp.lt.u32.totalorder %s1435_s29, %s1794_s3 }
  0x28   : > { %p1438_p1 = pnand %p1436_p8, %p1409_p9 }
  0x2a   : > { %p1439_p4 = pneg %p1438_p1 }
  0x2c   : > { %p1444_p10 = pnand %p1442_p5, %p1439_p4 }
  0x2e   : > { %1447 = shalt.err (!%p1444_p10)
}
  0x2f   : > { %s1448_s27 = scalar_lea.vmem %s1618_s30, 1024  ;;  %p1456_p0 = scmp.lt.s32.totalorder %s1618_s30, %s1618_s30 }
  0x30   : > { %p1449_p11 = scmp.ne.s32.totalorder %s1618_s30, %s1448_s27  ;;  %p1457_p2 = scmp.lt.s32.totalorder %s1448_s27, %s1448_s27 }
  0x32   : > { %p1451_p12 = pnand %p1449_p11, %p1409_p9  ;;  %p1458_p3 = por %p1457_p2, %p1456_p0 }
  0x34   : > { %p1452_p13 = pneg %p1451_p12 }
  0x36   : > { %p1459_p6 = pnand %p1458_p3, %p1452_p13 }
  0x38   : > { %1462 = shalt.err (!%p1459_p6)
}
  0x39   : > { %1292 = dma.hbm_to_vmem [thread:$0]  (!%p1614_p7), %s1794_s3, 1024, %s1618_s30, [#allocation5], %s1535_s14, %s1535_s14, %s1536_s15  }
  0x3a   : > { %s1668_s12 = sadd.s32 1, %s1531_s21   ;;  %s26_s13 = sadd.s32 1, %s1527_s20 }
  0x3b   : > { %s23_s28 = ssub.s32 %s1531_s21, %s1668_s12  ;;  %p33_p9 = scmp.ne.s32.totalorder %s1527_s20, %s1523_s19 }
  0x3c   : > { %p24_p8 = scmp.eq.s32.totalorder %s23_s28, 0  ;;  %p34_p1 = scmp.eq.s32.totalorder %s1531_s21, 0 }
  0x3d   : > { %p1299_p4 = scmp.lt.s32.totalorder %s1531_s21, 2  ;;  %s205_s16 = sand.u32 1, %s1527_s20  }
  0x3e   : > { %s1679_s17 = scalar_select %p24_p8, %s1527_s20, %s26_s13  }
  0x3f   : > { %p35_p5 = por %p34_p1, %p33_p9  ;;  %s1273_s18 = smul.u32 112, %s205_s16 }
  0x40   : > { %s1274_s26 = smul.u32 1792, %s1531_s21  ;;  %s1693_s8 = scalar_lea.sflag [#allocation3], %s205_s16 }
  0x41   : > { %p1682_p10 = pnand %p1299_p4, %p35_p5  ;;  %s209_s6 = scalar_lea.vmem [#allocation2], %s1273_s18 }
  0x42   : > { %s1689_s15 = scalar_lea.hbm %s1791_s0, %s1274_s26  ;;  %s217_s7 = sshll.u32 %s209_s6, 4  ;;  %s1691_s7 = int_to_ptr.vmem [resolvable:$true] %s217_s7 }
  0x43   : > { %s1463_s9 = scalar_lea.hbm %s1689_s15, 1792  ;;  %p1465_p11 = pneg %p1682_p10 }
  0x44   : > { %p1464_p7 = scmp.ne.s32.totalorder %s1689_s15, %s1463_s9  ;;  %s1468_s11 = scalar_lea.hbm %s1791_s0, 3584 }
  0x45   : > { %p1469_p0 = scmp.lt.u32.totalorder %s1689_s15, %s1791_s0  ;;  %p1470_p2 = scmp.lt.u32.totalorder %s1468_s11, %s1463_s9 }
  0x46   : > { %p1466_p12 = pnand %p1465_p11, %p1464_p7  ;;  %p1472_p6 = scmp.lt.u32.totalorder %s1463_s9, %s1689_s15 }
  0x47   : > { %p1471_p3 = por %p1470_p2, %p1469_p0 }
  0x48   : > { %p1467_p13 = pneg %p1466_p12 }
  0x49   : > { %p1473_p9 = por %p1472_p6, %p1471_p3 }
  0x4b   : > { %p1474_p8 = pnand %p1473_p9, %p1467_p13 }
  0x4d   : > { %1477 = shalt.err (!%p1474_p8)
}
  0x4e   : > { %s1478_s16 = scalar_lea.vmem %s1691_s7, 1792  ;;  %s1537_s18 = smov [#allocation2]  }
  0x4f   : > { %p1479_p1 = scmp.ne.s32.totalorder %s1691_s7, %s1478_s16  ;;  %s1483_s26 = sshll.u32 %s1537_s18, 4  ;;  %s1484_s26 = int_to_ptr.vmem [resolvable:$false] %s1483_s26 }
  0x50   : > { %s1485_s30 = scalar_lea.vmem %s1484_s26, 3584  ;;  %p1486_p7 = scmp.lt.s32.totalorder %s1691_s7, %s1484_s26 }
  0x51   : > { %p1481_p4 = pnand %p1479_p1, %p1465_p11  ;;  %p1487_p12 = scmp.lt.s32.totalorder %s1485_s30, %s1478_s16 }
  0x53   : > { %p1482_p5 = pneg %p1481_p4  ;;  %p1488_p0 = por %p1487_p12, %p1486_p7 }
  0x55   : > { %p1489_p2 = pnand %p1488_p0, %p1482_p5 }
  0x57   : > { %1492 = shalt.err (!%p1489_p2)
}
  0x58   : > { %s1538_s14 = smov 896   ;;  %s1539_s6 = smov 56  }
  0x59   : > { %1296 = dma.hbm_to_vmem [thread:$0]  (!%p1682_p10), %s1689_s15, 1792, %s1691_s7, %s1693_s8, %s1538_s14, %s1538_s14, %s1539_s6  }
  0x5a   : > { %p1806_p11 = scmp.ne.s32.totalorder %s1803_s25, 0 }
  0x5b   : > { %s231_s9 = sand.u32 (!%p1806_p11), 1, %s1523_s19   ;;  %p1807_p13 = scmp.ne.s32.totalorder (!%p1806_p11), %s1802_s24, 0 }
  0x5c   : > { %229 = sbr.rel (%p1806_p11) target bundleno = 928 (0x3a0), region = 40  ;;  %s232_s10 = scalar_lea.sflag (!%p1806_p11), [#allocation3], %s231_s9 }
  0x5d   : > { %s1275_s27 = smul.u32 (!%p1806_p11), 112, %s231_s9 }
  0x5f   : > { %s1724_s11 = scalar_lea.vmem (!%p1806_p11), [#allocation2], %s1275_s27 }
  0x63   : > { %1510 = dma.done.wait (%p1807_p13), %s232_s10, 1792  }
  0x64   : > { %1512 = vsyncadd (%p1807_p13), %s232_s10, 4294965504  ;;  %p1808_p3 = scmp.ne.s32.totalorder %s1801_s23, 0 }
  0x66   : > { %1514 = dma.done.wait (%p1808_p3), [#allocation5], 7296  }
  0x67   : > { %1516 = vsyncadd (%p1808_p3), [#allocation5], 4294960000  ;;  %v1342_v0 = vld [vmem:[#allocation4 + $0x40] sm:$0xff]   ;;  %v1346_v4 = vld [vmem:[#allocation4 + $0x48] sm:$0xff]   ;;  %v1540_v43 = vmov 0.0   ;;  %vm1541_vm0 = vmmov 0  }
  0x68   : > { %v1343_v1 = vld [vmem:[#allocation4] sm:$0xff]   ;;  %1170 = vmatprep.subr.bf16.mxu0 %v1342_v0  ;;  %v1347_v5 = vld [vmem:[#allocation4 + $0x8] sm:$0xff]   ;;  %v1350_v8 = vld [vmem:[#allocation4 + $0x50] sm:$0xff]   ;;  %vm698_vm1 = vcmask 130048   ;;  %vm981_vm2 = vcmask 80896   ;;  %s1106_s15 = sshll.u32 %s1094_s22, 1 }
  0x69   : > { %v1344_v2 = vld [vmem:[#allocation4 + $0xc0] sm:$0xff]   ;;  %1171 = vmatpush3.bf16.msra.mxu0 %v1343_v1  ;;  %v1348_v6 = vld [vmem:[#allocation4 + $0xc8] sm:$0xff]   ;;  %v1351_v9 = vld [vmem:[#allocation4 + $0x10] sm:$0xff]   ;;  %p272_p10 = scmp.lt.s32.totalorder %s1106_s15, 3 }
  0x6a   : > { %v1345_v3 = vld [vmem:[#allocation4 + $0x80] sm:$0xff]   ;;  %1192 = vmatprep.subr.bf16.mxu1 %v1344_v2  ;;  %1172 = vmatprep.subr.bf16.mxu0 %v1346_v4  ;;  %v1349_v7 = vld [vmem:[#allocation4 + $0x88] sm:$0xff]   ;;  %v1352_v10 = vld [vmem:[#allocation4 + $0xd0] sm:$0xff]  }
  0x6b   : > { %1193 = vmatpush3.bf16.msra.mxu1 %v1345_v3  ;;  %v1353_v11 = vld [vmem:[#allocation4 + $0x90] sm:$0xff]   ;;  %v1354_v12 = vld [vmem:[#allocation4 + $0x58] sm:$0xff]   ;;  %v1358_v16 = vld [vmem:[#allocation4 + $0x60] sm:$0xff]   ;;  %s1814_s15 = smov (!%p272_p10, %s1106_s15), 3 }
  0x6c   : > { %1194 = vmatprep.subr.bf16.mxu1 %v1348_v6  ;;  %v1355_v13 = vld [vmem:[#allocation4 + $0x18] sm:$0xff]   ;;  %v1359_v17 = vld [vmem:[#allocation4 + $0x20] sm:$0xff]   ;;  %v1362_v20 = vld [vmem:[#allocation4 + $0x68] sm:$0xff]   ;;  %s1107_s7 = sshll.u32 %s1814_s15, 3 }
  0x6d   : > { %1173 = vmatpush3.bf16.msra.mxu0 %v1347_v5  ;;  %v1356_v14 = vld [vmem:[#allocation4 + $0xd8] sm:$0xff]   ;;  %v1360_v18 = vld [vmem:[#allocation4 + $0xe0] sm:$0xff]   ;;  %v1363_v21 = vld [vmem:[#allocation4 + $0x28] sm:$0xff]   ;;  %s275_s28 = scalar_lea.vmem %s1796_s5, %s1107_s7 }
  0x6e   : > { %1174 = vmatprep.subr.bf16.mxu0 %v1350_v8  ;;  %v1357_v15 = vld [vmem:[#allocation4 + $0x98] sm:$0xff]   ;;  %v1361_v19 = vld [vmem:[#allocation4 + $0xa0] sm:$0xff]   ;;  %v1364_v22 = vld [vmem:[#allocation4 + $0xe8] sm:$0xff]  }
  0x6f   : > { %1195 = vmatpush3.bf16.msra.mxu1 %v1349_v7  ;;  %v1365_v23 = vld [vmem:[#allocation4 + $0xa8] sm:$0xff]   ;;  %v1366_v24 = vld [vmem:[#allocation4 + $0x70] sm:$0xff]   ;;  %v1370_v28 = vld [vmem:[#allocation4 + $0x78] sm:$0xff]  }
  0x70   : > { %1196 = vmatprep.subr.bf16.mxu1 %v1352_v10  ;;  %v1367_v25 = vld [vmem:[#allocation4 + $0x30] sm:$0xff]   ;;  %v1371_v29 = vld [vmem:[#allocation4 + $0x38] sm:$0xff]   ;;  %v1374_v38 = vld [vmem:[#allocation4 + $0x140] sm:$0xff]  }
  0x71   : > { %1175 = vmatpush3.bf16.msra.mxu0 %v1351_v9  ;;  %v1368_v26 = vld [vmem:[#allocation4 + $0xf0] sm:$0xff]   ;;  %v1372_v30 = vld [vmem:[#allocation4 + $0xf8] sm:$0xff]   ;;  %v1375_v42 = vld [vmem:[#allocation4 + $0x100] sm:$0xff]  }
  0x72   : > { %1176 = vmatprep.subr.bf16.mxu0 %v1354_v12  ;;  %v1369_v27 = vld [vmem:[#allocation4 + $0xb0] sm:$0xff]   ;;  %v279_v31 = vld [vmem:[%s1724_s11 + $0x8] sm:$0xff]  ;;  %v285_v36 = vld [vmem:[%s1724_s11 + $0x38] sm:$0xff] }
  0x73   : > { %1197 = vmatpush3.bf16.msra.mxu1 %v1353_v11  ;;  %v286_v32 = vld [vmem:[%s1724_s11 + $0x40] sm:$0xff]  ;;  %v1373_v34 = vld [vmem:[#allocation4 + $0xb8] sm:$0xff]   ;;  %v288_v40 = vld [vmem:[%s1724_s11 + $0x50] sm:$0xff] }
  0x74   : > { %1198 = vmatprep.subr.bf16.mxu1 %v1356_v14  ;;  %v293_v33 = vpack.c.bf16 %v286_v32, %v279_v31  ;;  %v278_v35 = vld [vmem:[%s1724_s11] sm:$0xff]  ;;  %v281_v39 = vld [vmem:[%s1724_s11 + $0x18] sm:$0xff]  ;;  %v280_v44 = vld [vmem:[%s1724_s11 + $0x10] sm:$0xff] }
  0x75   : > { %1177 = vmatpush3.bf16.msra.mxu0 %v1355_v13  ;;  %v292_v37 = vpack.c.bf16 %v285_v36, %v278_v35  ;;  %v295_v41 = vpack.c.bf16 %v288_v40, %v281_v39  ;;  %v287_v45 = vld [vmem:[%s1724_s11 + $0x48] sm:$0xff]  ;;  %v1378_v49 = vld [vmem:[#allocation4 + $0x150] sm:$0xff]   ;;  %v1382_v53 = vld [vmem:[#allocation4 + $0x160] sm:$0xff]  }
  0x76   : > { %1178 = vmatprep.subr.bf16.mxu0 %v1358_v16  ;;  %734 = vmatprep.mubr.bf16.mxu0 %v293_v33  ;;  %v294_v46 = vpack.c.bf16 %v287_v45, %v280_v44  ;;  %v1376_v47 = vld [vmem:[#allocation4 + $0x148] sm:$0xff]   ;;  %v1379_v50 = vld [vmem:[#allocation4 + $0x110] sm:$0xff]   ;;  %v1380_v51 = vld [vmem:[#allocation4 + $0x158] sm:$0xff]  }
  0x77   : > { %1199 = vmatpush3.bf16.msra.mxu1 %v1357_v15  ;;  %775 = vmatprep.mubr.bf16.mxu1 %v295_v41  ;;  %v1377_v48 = vld [vmem:[#allocation4 + $0x108] sm:$0xff]   ;;  %v1381_v52 = vld [vmem:[#allocation4 + $0x118] sm:$0xff]   ;;  %v1383_v54 = vld [vmem:[#allocation4 + $0x120] sm:$0xff]  }
  0x78   : > { %1200 = vmatprep.subr.bf16.mxu1 %v1360_v18  ;;  %v1384_v55 = vld [vmem:[#allocation4 + $0x168] sm:$0xff]   ;;  %v1390_v56 = vld [vmem:[#allocation4 + $0x180] sm:$0xff]   ;;  %v1386_v59 = vld [vmem:[#allocation4 + $0x170] sm:$0xff]  }
  0x79   : > { %1179 = vmatpush3.bf16.msra.mxu0 %v1359_v17  ;;  %v283_v57 = vld [vmem:[%s1724_s11 + $0x28] sm:$0xff]  ;;  %v290_v60 = vld [vmem:[%s1724_s11 + $0x60] sm:$0xff]  ;;  %v284_v62 = vld [vmem:[%s1724_s11 + $0x30] sm:$0xff] }
  0x7a   : > { %1180 = vmatprep.subr.bf16.mxu0 %v1362_v20  ;;  %v1385_v58 = vld [vmem:[#allocation4 + $0x128] sm:$0xff]   ;;  %v297_v61 = vpack.c.bf16 %v290_v60, %v283_v57  ;;  %v1387_v1 = vld [vmem:[#allocation4 + $0x130] sm:$0xff]   ;;  %v1388_v2 = vld [vmem:[#allocation4 + $0x178] sm:$0xff]  }
  0x7b   : > { %1201 = vmatpush3.bf16.msra.mxu1 %v1361_v19  ;;  %v291_v63 = vld [vmem:[%s1724_s11 + $0x68] sm:$0xff]  ;;  %v282_v4 = vld [vmem:[%s1724_s11 + $0x20] sm:$0xff]  ;;  %v289_v5 = vld [vmem:[%s1724_s11 + $0x58] sm:$0xff] }
  0x7c   : > { %1202 = vmatprep.subr.bf16.mxu1 %v1364_v22  ;;  %v298_v0 = vpack.c.bf16 %v291_v63, %v284_v62  ;;  %v1389_v3 = vld [vmem:[#allocation4 + $0x138] sm:$0xff]   ;;  %v296_v6 = vpack.c.bf16 %v289_v5, %v282_v4  ;;  %v1391_v7 = vld [vmem:[#allocation6] sm:$0xff]   ;;  %v1392_v8 = vld [vmem:[#allocation6 + $0x8] sm:$0xff]  }
  0x7d   : > { %1181 = vmatpush3.bf16.msra.mxu0 %v1363_v21  ;;  %v1393_v9 = vld [vmem:[#allocation6 + $0x10] sm:$0xff]   ;;  %v1394_v10 = vld [vmem:[#allocation6 + $0x18] sm:$0xff]   ;;  %v1395_v11 = vld [vmem:[#allocation6 + $0x20] sm:$0xff]  }
  0x7e   : > { %1182 = vmatprep.subr.bf16.mxu0 %v1366_v24  ;;  %v1396_v12 = vld [vmem:[#allocation6 + $0x28] sm:$0xff]   ;;  %v1397_v13 = vld [vmem:[#allocation6 + $0x30] sm:$0xff]   ;;  %v1398_v14 = vld [vmem:[#allocation6 + $0x38] sm:$0xff]  }
  0x7f   : > { %1203 = vmatpush3.bf16.msra.mxu1 %v1365_v23  ;;  %v1108_v16 = vld [vmem:[%s1793_s2] ss:$0 sm:$0xff] }
  0x80   : > { %1204 = vmatprep.subr.bf16.mxu1 %v1368_v26 }
  0x81   : > { %1183 = vmatpush3.bf16.msra.mxu0 %v1367_v25 }
  0x82   : > { %1184 = vmatprep.subr.bf16.mxu0 %v1370_v28 }
  0x83   : > { %1205 = vmatpush3.bf16.msra.mxu1 %v1369_v27 }
  0x84   : > { %1206 = vmatprep.subr.bf16.mxu1 %v1372_v30 }
  0x85   : > { %1185 = vmatpush3.bf16.msra.mxu0 %v1371_v29 }
  0x86   : > { %1214 = vmatprep.subr.bf16.mxu0 %v1374_v38 }
  0x87   : > { %1207 = vmatpush3.bf16.msra.mxu1 %v1373_v34 }
  0x88   : > { %1247 = vmatprep.subr.bf16.mxu1 %v1540_v43  ;;  %735 = vmatmul.mubr.bf16.vlgmr.msra.gmra.mrb[0].mxu0 %v292_v37 }
  0x89   : > { %1215 = vmatpush3.bf16.msra.mxu0 %v1375_v42  ;;  %816 = vmatprep.mubr.bf16.mxu0 %v297_v61 }
  0x8a   : > { %776 = vmatmul.mubr.bf16.vlgmr.msra.gmra.mrb[0].mxu1 %v294_v46  ;;  %1216 = vmatprep.subr.bf16.mxu0 %v1376_v47 }
  0x8b   : > { %1249 = vmatprep.mubr.msk.bf16.mxu1 %vm1541_vm0, %v1540_v43  ;;  %1248 = vmatpush3.bf16.msra.mxu1 %v1390_v56 }
  0x8c   : > { %1253 = vmatprep.subr.bf16.mxu1 %v1540_v43 }
  0x8d   : > { %1217 = vmatpush3.bf16.msra.mxu0 %v1377_v48 }
  0x8e   : > { %1218 = vmatprep.subr.bf16.mxu0 %v1378_v49  ;;  %v1159_v49 = vld [vmem:[%s1795_s4] ss:$0 sm:$0xff] }
  0x91   : > { %1219 = vmatpush3.bf16.msra.mxu0 %v1379_v50 }
  0x92   : > { %1220 = vmatprep.subr.bf16.mxu0 %v1380_v51  ;;  %1250 = vmatmul.mubr.msk.bf16.vlgmr.msra.gmra.mrb[4].mxu1 %vm698_vm1, %v298_v0 }
  0x93   : > { %1269 = vmatprep.mubr.msk.bf16.mxu1 %vm1541_vm0, %v1540_v43  ;;  %1254 = vmatpush3.bf16.msra.mxu1 %v1391_v7 }
  0x94   : > { %1255 = vmatprep.subr.bf16.mxu1 %v1540_v43 }
  0x95   : > { %1221 = vmatpush3.bf16.msra.mxu0 %v1381_v52 }
  0x96   : > { %1222 = vmatprep.subr.bf16.mxu0 %v1382_v53 }
  0x97   : > { %1256 = vmatpush3.bf16.msra.mxu1 %v1392_v8 }
  0x98   : > { %1257 = vmatprep.subr.bf16.mxu1 %v1540_v43 }
  0x99   : > { %1223 = vmatpush3.bf16.msra.mxu0 %v1383_v54 }
  0x9a   : > { %1224 = vmatprep.subr.bf16.mxu0 %v1384_v55 }
  0x9b   : > { %1258 = vmatpush3.bf16.msra.mxu1 %v1393_v9 }
  0x9c   : > { %1259 = vmatprep.subr.bf16.mxu1 %v1540_v43 }
  0x9d   : > { %1225 = vmatpush3.bf16.msra.mxu0 %v1385_v58 }
  0x9e   : > { %1226 = vmatprep.subr.bf16.mxu0 %v1386_v59 }
  0x9f   : > { %1260 = vmatpush3.bf16.msra.mxu1 %v1394_v10 }
  0xa0   : > { %1261 = vmatprep.subr.bf16.mxu1 %v1540_v43 }
  0xa1   : > { %1227 = vmatpush3.bf16.msra.mxu0 %v1387_v1 }
  0xa2   : > { %1228 = vmatprep.subr.bf16.mxu0 %v1388_v2 }
  0xa3   : > { %1262 = vmatpush3.bf16.msra.mxu1 %v1395_v11 }
  0xa4   : > { %1263 = vmatprep.subr.bf16.mxu1 %v1540_v43 }
  0xa5   : > { %1229 = vmatpush3.bf16.msra.mxu0 %v1389_v3 }
  0xa7   : > { %1264 = vmatpush3.bf16.msra.mxu1 %v1396_v12 }
  0xa8   : > { %817 = vmatmul.mubr.bf16.vlgmr.msra.gmra.mrb[4].mxu0 %v296_v6  ;;  %1265 = vmatprep.subr.bf16.mxu1 %v1540_v43 }
  0xab   : > { %1266 = vmatpush3.bf16.msra.mxu1 %v1397_v13 }
  0xac   : > { %1267 = vmatprep.subr.bf16.mxu1 %v1540_v43 }
  0xaf   : > { %1268 = vmatpush3.bf16.msra.mxu1 %v1398_v14 }
 0x15b   : > { %v1186_v15 = vpop.f32.mrb[0].mxu0 }
 0x15c   : > { %v1187_v17 = vpop.f32.mrb[1].mxu0 }
 0x15d   : > { %v1188_v18 = vadd.f32 %v1187_v17, %v1186_v15  ;;  %v1189_v19 = vpop.f32.mrb[2].mxu0  ;;  %v1208_v20 = vpop.f32.mrb[0].mxu1 }
 0x15e   : > { %v1190_v21 = vpop.f32.mrb[3].mxu0  ;;  %v1209_v24 = vpop.f32.mrb[1].mxu1 }
 0x15f   : > { %v737_v22 = vadd.f32 %v1188_v18, %v1108_v16  ;;  %v1191_v23 = vadd.f32 %v1190_v21, %v1189_v19  ;;  %v1210_v25 = vadd.f32 %v1209_v24, %v1208_v20  ;;  %v1211_v26 = vpop.f32.mrb[2].mxu1 }
 0x160   : > { %v1212_v28 = vpop.f32.mrb[3].mxu1 }
 0x161   : > { %v740_v27 = vadd.f32 %v1191_v23, %v1108_v16  ;;  %v778_v29 = vadd.f32 %v1210_v25, %v737_v22  ;;  %v1213_v30 = vadd.f32 %v1212_v28, %v1211_v26 }
 0x163   : > { %v781_v31 = vadd.f32 %v1213_v30, %v740_v27 }
 0x165   : > { %v859_v32 = vpop.f32.mrb[4].mxu1 }
 0x166   : > { %v1251_v33 = vpop.f32.mrb[5].mxu1 }
 0x167   : > { %v862_v34 = vpop.f32.mrb[6].mxu1 }
 0x168   : > { %v1252_v35 = vpop.f32.mrb[7].mxu1 }
 0x17b   : > { %v1230_v36 = vpop.f32.mrb[4].mxu0 }
 0x17c   : > { %v1231_v37 = vpop.f32.mrb[5].mxu0 }
 0x17d   : > { %v1232_v38 = vadd.f32 %v1231_v37, %v1230_v36  ;;  %v1233_v39 = vpop.f32.mrb[6].mxu0 }
 0x17e   : > { %v1234_v40 = vpop.f32.mrb[7].mxu0 }
 0x17f   : > { %v819_v41 = vadd.f32 %v1232_v38, %v778_v29  ;;  %v1235_v42 = vadd.f32 %v1234_v40, %v1233_v39 }
 0x181   : > { %v860_v43 = vadd.f32 %v859_v32, %v819_v41  ;;  %v822_v44 = vadd.f32 %v1235_v42, %v781_v31 }
 0x183   : > { %v863_v45 = vadd.f32 %v862_v34, %v822_v44  ;;  %v866_v46 = vmax.f32 %v860_v43, 0.0 }
 0x185   : > { %v867_v47 = vmax.f32 %v863_v45, 0.0 }
 0x187   : > { %v868_v48 = vpack.c.bf16 %v867_v47, %v866_v46 }
 0x189   : > { %1270 = vmatmul.mubr.bf16.vlgmr.msra.gmra.mrb[8].mxu1 %v868_v48 }
 0x25c   : > { %v974_v50 = vpop.f32.mrb[8].mxu1 }
 0x25d   : > { %v975_v51 = vadd.f32 %v1159_v49, %v974_v50  ;;  %v1271_v52 = vpop.f32.mrb[9].mxu1 }
 0x25e   : > { %v977_v53 = vpop.f32.mrb[10].mxu1 }
 0x25f   : > { %v978_v54 = vadd.f32 %v1159_v49, %v977_v53  ;;  %v1272_v55 = vpop.f32.mrb[11].mxu1  ;;  %v982_v56 = vsel %vm981_vm2, %v975_v51, -inf }
 0x260   : > { %983 = vmax.xlane.f32.xlu0 %v982_v56 }
 0x261   : > { %v985_v57 = vsel %vm981_vm2, %v978_v54, -inf }
 0x264   : > { %986 = vmax.xlane.f32.xlu0 %v985_v57 }
 0x2ed   : > { %v984_v58 = vpop.xlane.xlu0 %983 }
 0x2ee   : > { %v988_v59 = vsub.f32 %v975_v51, %v984_v58 }
 0x2f0   : > { %v990_v60 = vmul.f32 1.442695, %v988_v59 }
 0x2f1   : > { %v987_v61 = vpop.xlane.xlu0 %986 }
 0x2f2   : > { %1399 = vpow2.f32 %v990_v60  ;;  %v989_v62 = vsub.f32 %v978_v54, %v987_v61 }
 0x2f4   : > { %v992_v63 = vmul.f32 1.442695, %v989_v62 }
 0x2f6   : > { %1401 = vpow2.f32 %v992_v63 }
 0x2fc   : > { %v1400_v0 = vpop.eup %1399 }
 0x2fd   : > { %v994_v1 = vsel %vm981_vm2, %v1400_v0, 0.0 }
 0x2fe   : > { %995 = vadd.xlane.f32.xlu1 %v994_v1 }
 0x300   : > { %v1402_v2 = vpop.eup %1401 }
 0x301   : > { %v997_v3 = vsel %vm981_vm2, %v1402_v2, 0.0 }
 0x302   : > { %998 = vadd.xlane.f32.xlu1 %v997_v3 }
 0x38b   : > { %v996_v4 = vpop.xlane.xlu1 %995 }
 0x38c   : > { %1403 = vlog2.f32 %v996_v4 }
 0x38f   : > { %v999_v5 = vpop.xlane.xlu1 %998 }
 0x390   : > { %1405 = vlog2.f32 %v999_v5 }
 0x396   : > { %v1404_v6 = vpop.eup %1403 }
 0x397   : > { %v1001_v7 = vmul.f32 0.6931472, %v1404_v6 }
 0x399   : > { %v1004_v8 = vsub.f32 %v988_v59, %v1001_v7 }
 0x39a   : > { %v1406_v9 = vpop.eup %1405 }
 0x39b   : > { %1006 = vst.msk [vmem:[%s275_s28] sm:$0xff] %vm981_vm2, %v1004_v8  ;;  %v1003_v10 = vmul.f32 0.6931472, %v1406_v9 }
 0x39d   : > { %v1005_v11 = vsub.f32 %v989_v62, %v1003_v10 }
 0x39f   : > { %1007 = vst.msk [vmem:[%s275_s28 + $0x8] sm:$0xff] %vm981_vm2, %v1005_v11 }
 0x3a0 PF: > { %p16_p6 = scmp.ge.s32.totalorder %s1668_s12, 4   ;;  %s1809_s18 = smov %s1523_s19 }
 0x3a1   : > { %s1810_s19 = smov %s1527_s20  ;;  %s1811_s20 = smov %s1679_s17 }
 0x3a2   : > { %s1812_s21 = smov %s1668_s12  ;;  %18 = sbr.rel (!%p16_p6) target bundleno = 4 (0x4), region = 88 }
 0x3a9   :  { %1030 = vsyncpa [#allocation3], 1 }
 0x3aa   :  { %1032 = vsyncpa [#allocation3 + $0x1], 1 }
 0x3ab   :  { %1033 = vsyncpa [#allocation5], 1 }

</bundles_post_ra>
